<compile_context>
chip_gen: v6e
topology: v6e:2x2x1
jax: 0.10.0
libtpu: 0.0.40
codegen_flags: <defaults>
</compile_context>

<pallas_src>
import functools
import math

import jax
import jax.numpy as jnp
from jax.experimental import pallas as pl
from jax.experimental.pallas import tpu as pltpu


_NEG_BIG = -1e30  # finite "-inf": keeps max()/exp() well-defined on padded cols


def _round_up(x, m):
    return ((x + m - 1) // m) * m


def _cdiv(a, b):
    return -(-a // b)


def _vmem_capacity_bytes():
    """Generation-aware VMEM capacity (64 MiB on v7x, 128 MiB on v5e/v6e)."""
    try:
        return int(pltpu.get_tpu_info().vmem_capacity_bytes)
    except Exception:
        return 128 * 1024 * 1024


def _plain_header_kernel(x_ref, wt_ref, gt_ref, bias_ref, loss_ref,
                         m_ref, l_ref, p_ref):
    """One (batch-tile, class-tile) step of linear + online-LSE cross entropy."""
    j = pl.program_id(1)  # class-tile index (reduction axis, last in grid)

    @pl.when(j == 0)
    def _init():
        m_ref[...] = jnp.full_like(m_ref, -jnp.inf)
        l_ref[...] = jnp.zeros_like(l_ref)
        p_ref[...] = jnp.zeros_like(p_ref)

    # Contract over E directly (no transpose of the weight tile); operands stay
    # in their input dtype (bf16 feeds the MXU directly), f32 accumulation.
    logits = jax.lax.dot_general(
        x_ref[...], wt_ref[...],
        dimension_numbers=(((1,), (1,)), ((), ())),
        preferred_element_type=jnp.float32)              # (tile_b, tile_c) f32

    tile_c = logits.shape[1]

    # Padded-class handling: a streamed (1, tile_c) additive bias row
    # (0 for real classes, -1e30 for padded columns) -> one broadcast add
    # instead of a full-tile compare+select on every class tile.
    logits = logits + bias_ref[...]

    # Ground-truth pick: (1, tile_c) column ids broadcast against (tile_b, 1)
    # gt inside the compare (no full-tile iota kept live in vregs).
    col_ids = (jax.lax.broadcasted_iota(jnp.int32, (1, tile_c), 1)
               + j * tile_c)
    gt = gt_ref[...]                                      # (tile_b, 1) int32
    p_ref[...] += jnp.sum(jnp.where(col_ids == gt, logits, 0.0),
                          axis=-1, keepdims=True)

    # Online log-sum-exp update.
    m_prev = m_ref[...]
    m_new = jnp.maximum(m_prev, jnp.max(logits, axis=-1, keepdims=True))
    alpha = jnp.exp(m_prev - m_new)
    l_ref[...] = alpha * l_ref[...] + jnp.sum(jnp.exp(logits - m_new),
                                              axis=-1, keepdims=True)
    m_ref[...] = m_new

    @pl.when(j == pl.num_programs(1) - 1)
    def _finalize():
        # Per-row cross-entropy; written once per batch tile.
        loss_ref[...] = m_ref[...] + jnp.log(l_ref[...]) - p_ref[...]


def _select_tiles(b, c, e, itemsize, tile_b, tile_c, vmem_cap):
    """Pick (tile_b, tile_c) against roofline + VMEM + megacore constraints."""
    # Sublane packing for the batch tile: 8 rows f32, 16 rows bf16, 32 int8.
    sub = max(8, 32 // itemsize)
    # MXU-width alignment for the class tile (2x256x256 on v6e/v7x).
    lane = 256 if c >= 256 else 128

    if tile_c is None:
        tile_c = 512
    tile_c = max(lane, (tile_c // lane) * lane)
    tile_c = min(tile_c, _round_up(c, lane))

    if tile_b is None:
        # Roofline target: big enough that the once-per-batch-tile weight
        # stream from HBM is amortized by MXU work.
        tile_b = 512 if itemsize <= 2 else 1024
    tile_b = min(tile_b, _round_up(b, sub))
    tile_b = max(sub, (tile_b // sub) * sub)

    # v7x-class parts (<= 64 MiB VMEM, 2 TensorCores): keep >= 2 batch tiles so
    # the "parallel" grid axis feeds both cores.
    if vmem_cap <= 64 * 1024 * 1024 and b > sub:
        if _round_up(b, tile_b) // tile_b < 2:
            tile_b = max(sub, _round_up(_cdiv(b, 2), sub))

    # VMEM budget: double-buffered x block + (up to) triple-buffered wt block.
    def _block_bytes(tb, tc):
        return (2 * tb * e + 3 * tc * e) * itemsize

    budget = int(0.55 * vmem_cap)
    while _block_bytes(tile_b, tile_c) > budget and tile_b > sub:
        tile_b = max(sub, ((tile_b // 2) // sub) * sub)
    while _block_bytes(tile_b, tile_c) > budget and tile_c > lane:
        tile_c = max(lane, ((tile_c // 2) // lane) * lane)

    return tile_b, tile_c


def _wt_block_spec(tile_c, e, n_class_tiles):
    idx = lambda i, j: (j, 0)
    # Deeper weight pipeline when the class axis is long (HBM-bound stream).
    if n_class_tiles >= 3 and hasattr(pl, "Buffered"):
        try:
            return pl.BlockSpec((tile_c, e), idx, pipeline_mode=pl.Buffered(3))
        except TypeError:  # BlockSpec without pipeline_mode support
            pass
    return pl.BlockSpec((tile_c, e), idx)


def plain_header_loss(x, wt, gt, *, tile_b=None, tile_c=None,
                      compute_dtype=None):
    """x: (B, E), wt: (C, E), gt: (B,) int -> scalar f32 mean cross entropy.

    compute_dtype=jnp.bfloat16 casts the matmul operands at the boundary
    (halves weight HBM traffic, ~2x MXU throughput) with f32 accumulation and
    an f32 LSE epilogue.  Default (None) preserves the input dtype, matching
    the torch module's f32 forward semantics exactly.
    """
    b, e = x.shape
    c = wt.shape[0]
    assert wt.shape[1] == e and gt.shape == (b,)

    if compute_dtype is not None:
        x = x.astype(compute_dtype)
        wt = wt.astype(compute_dtype)

    itemsize = jnp.dtype(x.dtype).itemsize
    vmem_cap = _vmem_capacity_bytes()
    tile_b, tile_c = _select_tiles(b, c, e, itemsize, tile_b, tile_c, vmem_cap)

    pb = _round_up(b, tile_b)
    pc = _round_up(c, tile_c)
    grid = (pb // tile_b, pc // tile_c)

    xp = x if pb == b else jnp.pad(x, ((0, pb - b), (0, 0)))
    wp = wt if pc == c else jnp.pad(wt, ((0, pc - c), (0, 0)))
    gt2d = gt.reshape(b, 1).astype(jnp.int32)
    gp = gt2d if pb == b else jnp.pad(gt2d, ((0, pb - b), (0, 0)))

    # (1, pc) additive bias: 0 for real classes, -1e30 for padded columns.
    bias = jnp.where(jnp.arange(pc, dtype=jnp.int32) < c,
                     0.0, _NEG_BIG).astype(jnp.float32).reshape(1, pc)

    # Generation-aware VMEM limit: block buffers + stats + headroom, capped at
    # 3/4 of physical capacity.
    need = ((2 * tile_b + 3 * tile_c) * e * itemsize
            + 2 * (tile_b * 4 + tile_c * 4 + tile_b * 4) + 3 * tile_b * 4)
    vmem_limit = int(min(0.75 * vmem_cap, max(need + (8 << 20), 32 << 20)))

    cost = pl.CostEstimate(
        flops=2 * pb * pc * e,
        transcendentals=pb * pc,
        bytes_accessed=(pb * e * itemsize                   # x (once)
                        + grid[0] * pc * e * itemsize       # wt per batch tile
                        + grid[0] * pc * 4                  # class bias
                        + pb * 4 + pb * 4),                 # gt + loss
    )

    losses = pl.pallas_call(
        _plain_header_kernel,
        out_shape=jax.ShapeDtypeStruct((pb, 1), jnp.float32),
        grid_spec=pltpu.PrefetchScalarGridSpec(
            num_scalar_prefetch=0,
            grid=grid,
            in_specs=[
                pl.BlockSpec((tile_b, e), lambda i, j: (i, 0)),   # x
                _wt_block_spec(tile_c, e, grid[1]),               # wt (streamed)
                pl.BlockSpec((tile_b, 1), lambda i, j: (i, 0)),   # gt
                pl.BlockSpec((1, tile_c), lambda i, j: (0, j)),   # class bias
            ],
            out_specs=pl.BlockSpec((tile_b, 1), lambda i, j: (i, 0)),
            scratch_shapes=[pltpu.VMEM((tile_b, 1), jnp.float32)] * 3,
        ),
        compiler_params=pltpu.CompilerParams(
            dimension_semantics=("parallel", "arbitrary"),
            vmem_limit_bytes=vmem_limit,
        ),
        cost_estimate=cost,
    )(xp, wp, gp, bias)

    # Mean over the *true* batch size (drop padded rows).
    return jnp.mean(losses[:b, 0])


def _reference_loss(x, wt, gt):
    logits = x @ wt.T
    lse = jax.scipy.special.logsumexp(logits, axis=-1)
    picked = jnp.take_along_axis(logits, gt[:, None], axis=-1)[:, 0]
    return jnp.mean(lse - picked)


if __name__ == "__main__":
    key = jax.random.PRNGKey(0)
    kx, kw, kg = jax.random.split(key, 3)

    def _kaiming(k, c, e):
        # Kaiming-normal init for weight (C, E): fan_in = E, gain = sqrt(2).
        return jax.random.normal(k, (c, e), dtype=jnp.float32) * math.sqrt(2.0 / e)

    # 1) Aligned shapes, f32 (matches the torch module's dtype exactly).
    B, E, C = 32, 128, 256
    x = jax.random.normal(kx, (B, E), dtype=jnp.float32)
    wt = _kaiming(kw, C, E)
    gt = jax.random.randint(kg, (B,), 0, C, dtype=jnp.int32)
    loss = jax.jit(plain_header_loss)(x, wt, gt)
    jax.block_until_ready(loss)
    ref = _reference_loss(x, wt, gt)
    assert jnp.allclose(loss, ref, rtol=1e-4, atol=1e-4), (loss, ref)

    # 2) Unaligned shapes: batch padding + padded-class bias path.
    B2, E2, C2 = 10, 96, 200
    x2 = jax.random.normal(kx, (B2, E2), dtype=jnp.float32)
    wt2 = _kaiming(kw, C2, E2)
    gt2 = jax.random.randint(kg, (B2,), 0, C2, dtype=jnp.int32)
    loss2 = jax.jit(plain_header_loss)(x2, wt2, gt2)
    jax.block_until_ready(loss2)
    ref2 = _reference_loss(x2, wt2, gt2)
    assert jnp.allclose(loss2, ref2, rtol=1e-4, atol=1e-4), (loss2, ref2)

    # 3) Multiple class tiles: exercises online LSE across the class axis, the
    #    padded last class tile, and the 3-deep weight pipeline (1536 = 3x512).
    B3, E3, C3 = 24, 128, 1500
    x3 = jax.random.normal(kx, (B3, E3), dtype=jnp.float32)
    wt3 = _kaiming(kw, C3, E3)
    gt3 = jax.random.randint(kg, (B3,), 0, C3, dtype=jnp.int32)
    loss3 = jax.jit(plain_header_loss)(x3, wt3, gt3)
    jax.block_until_ready(loss3)
    ref3 = _reference_loss(x3, wt3, gt3)
    assert jnp.allclose(loss3, ref3, rtol=5e-4, atol=5e-4), (loss3, ref3)

    # 4) bf16 operand path (halves weight HBM traffic; f32 accumulation).
    loss_bf16 = jax.jit(
        functools.partial(plain_header_loss, compute_dtype=jnp.bfloat16)
    )(x, wt, gt)
    jax.block_until_ready(loss_bf16)
    assert jnp.allclose(loss_bf16, ref, rtol=3e-2, atol=3e-2), (loss_bf16, ref)

    print("KERNEL_OK")
</pallas_src>

<mosaic_0001>
module attributes {stable_mosaic.version = 11 : i64} {
  func.func @_plain_header_kernel(%arg0: i32, %arg1: i32, %arg2: memref<32x128xf32, #tpu.memory_space<vmem>>, %arg3: memref<256x128xf32, #tpu.memory_space<vmem>>, %arg4: memref<32x1xi32, #tpu.memory_space<vmem>>, %arg5: memref<1x256xf32, #tpu.memory_space<vmem>>, %arg6: memref<32x1xf32, #tpu.memory_space<vmem>>, %arg7: memref<32x1xf32, #tpu.memory_space<vmem>>, %arg8: memref<32x1xf32, #tpu.memory_space<vmem>>, %arg9: memref<32x1xf32, #tpu.memory_space<vmem>>) attributes {dimension_semantics = [#tpu.dimension_semantics<parallel>, #tpu.dimension_semantics<arbitrary>], iteration_bounds = array<i64: 1, 1>, scalar_prefetch = 0 : i64, scratch_operands = 3 : i64, tpu.core_type = #tpu.core_type<tc>, window_params = [{transform_indices = @transform_0, window_bounds = array<i64: 32, 128>}, {transform_indices = @transform_1, window_bounds = array<i64: 256, 128>}, {transform_indices = @transform_2, window_bounds = array<i64: 32, 1>}, {transform_indices = @transform_3, window_bounds = array<i64: 1, 256>}, {transform_indices = @transform_4, window_bounds = array<i64: 32, 1>}]} {
    %c0_i32 = arith.constant 0 : i32
    %0 = arith.cmpi eq, %arg1, %c0_i32 : i32
    %1 = arith.extui %0 : i1 to i32
    %c0_i32_0 = arith.constant 0 : i32
    %2 = arith.cmpi ne, %1, %c0_i32_0 : i32
    scf.if %2 {
      %cst_26 = arith.constant 0xFF800000 : f32
      %43 = vector.broadcast %cst_26 : f32 to vector<32x1xf32>
      %c0_27 = arith.constant 0 : index
      %c0_28 = arith.constant 0 : index
      %44 = vector.load %arg7[%c0_27, %c0_28] : memref<32x1xf32, #tpu.memory_space<vmem>>, vector<32x1xf32>
      tpu.vector_store %arg7[%c0_27, %c0_28], %43 {strides = array<i32>} : memref<32x1xf32, #tpu.memory_space<vmem>>, vector<32x1xf32>,
      %cst_29 = arith.constant 0.000000e+00 : f32
      %45 = vector.broadcast %cst_29 : f32 to vector<32x1xf32>
      %c0_30 = arith.constant 0 : index
      %c0_31 = arith.constant 0 : index
      %46 = vector.load %arg8[%c0_30, %c0_31] : memref<32x1xf32, #tpu.memory_space<vmem>>, vector<32x1xf32>
      tpu.vector_store %arg8[%c0_30, %c0_31], %45 {strides = array<i32>} : memref<32x1xf32, #tpu.memory_space<vmem>>, vector<32x1xf32>,
      %cst_32 = arith.constant 0.000000e+00 : f32
      %47 = vector.broadcast %cst_32 : f32 to vector<32x1xf32>
      %c0_33 = arith.constant 0 : index
      %c0_34 = arith.constant 0 : index
      %48 = vector.load %arg9[%c0_33, %c0_34] : memref<32x1xf32, #tpu.memory_space<vmem>>, vector<32x1xf32>
      tpu.vector_store %arg9[%c0_33, %c0_34], %47 {strides = array<i32>} : memref<32x1xf32, #tpu.memory_space<vmem>>, vector<32x1xf32>,
    } else {
    }
    %c0 = arith.constant 0 : index
    %c0_1 = arith.constant 0 : index
    %3 = vector.load %arg2[%c0, %c0_1] : memref<32x128xf32, #tpu.memory_space<vmem>>, vector<32x128xf32>
    %c0_2 = arith.constant 0 : index
    %c0_3 = arith.constant 0 : index
    %4 = vector.load %arg3[%c0_2, %c0_3] : memref<256x128xf32, #tpu.memory_space<vmem>>, vector<256x128xf32>
    %cst = arith.constant dense<0.000000e+00> : vector<32x256xf32>
    %5 = tpu.matmul %3, %4, %cst {dimension_numbers = #tpu.dot_dimension_numbers<[1], [1], [0], [0], [0, 0, 1, 0], [], []>} : vector<32x128xf32>, vector<256x128xf32>, vector<32x256xf32> -> vector<32x256xf32>
    %c0_4 = arith.constant 0 : index
    %c0_5 = arith.constant 0 : index
    %6 = vector.load %arg5[%c0_4, %c0_5] : memref<1x256xf32, #tpu.memory_space<vmem>>, vector<1x256xf32>
    %7 = vector.broadcast %6 : vector<1x256xf32> to vector<32x256xf32>
    %8 = arith.addf %5, %7 : vector<32x256xf32>
    %9 = tpu.iota {dimensions = array<i32: 1>} : vector<1x256xi32>
    %c256_i32 = arith.constant 256 : i32
    %10 = arith.muli %arg1, %c256_i32 : i32
    %11 = vector.broadcast %10 : i32 to vector<1x256xi32>
    %12 = arith.addi %9, %11 : vector<1x256xi32>
    %c0_6 = arith.constant 0 : index
    %c0_7 = arith.constant 0 : index
    %13 = vector.load %arg4[%c0_6, %c0_7] : memref<32x1xi32, #tpu.memory_space<vmem>>, vector<32x1xi32>
    %c0_8 = arith.constant 0 : index
    %c0_9 = arith.constant 0 : index
    %14 = vector.load %arg9[%c0_8, %c0_9] : memref<32x1xf32, #tpu.memory_space<vmem>>, vector<32x1xf32>
    %15 = vector.broadcast %12 : vector<1x256xi32> to vector<32x256xi32>
    %16 = vector.broadcast %13 : vector<32x1xi32> to vector<32x256xi32>
    %17 = arith.cmpi eq, %15, %16 : vector<32x256xi32>
    %cst_10 = arith.constant 0.000000e+00 : f32
    %18 = vector.broadcast %cst_10 : f32 to vector<32x256xf32>
    %19 = arith.select %17, %8, %18 : vector<32x256xi1>, vector<32x256xf32>
    %cst_11 = arith.constant dense<0.000000e+00> : vector<32xf32>
    %20 = vector.multi_reduction <add>, %19, %cst_11 [1] : vector<32x256xf32> to vector<32xf32>
    %21 = vector.shape_cast %20 : vector<32xf32> to vector<32x1xf32>
    %22 = arith.addf %14, %21 : vector<32x1xf32>
    %c0_12 = arith.constant 0 : index
    %c0_13 = arith.constant 0 : index
    %23 = vector.load %arg9[%c0_12, %c0_13] : memref<32x1xf32, #tpu.memory_space<vmem>>, vector<32x1xf32>
    tpu.vector_store %arg9[%c0_12, %c0_13], %22 {strides = array<i32>} : memref<32x1xf32, #tpu.memory_space<vmem>>, vector<32x1xf32>,
    %c0_14 = arith.constant 0 : index
    %c0_15 = arith.constant 0 : index
    %24 = vector.load %arg7[%c0_14, %c0_15] : memref<32x1xf32, #tpu.memory_space<vmem>>, vector<32x1xf32>
    %cst_16 = arith.constant dense<0xFF800000> : vector<32xf32>
    %25 = vector.multi_reduction <maximumf>, %8, %cst_16 [1] : vector<32x256xf32> to vector<32xf32>
    %26 = vector.shape_cast %25 : vector<32xf32> to vector<32x1xf32>
    %27 = arith.maximumf %24, %26 : vector<32x1xf32>
    %28 = arith.subf %24, %27 : vector<32x1xf32>
    %29 = math.exp %28 : vector<32x1xf32>
    %c0_17 = arith.constant 0 : index
    %c0_18 = arith.constant 0 : index
    %30 = vector.load %arg8[%c0_17, %c0_18] : memref<32x1xf32, #tpu.memory_space<vmem>>, vector<32x1xf32>
    %31 = arith.mulf %29, %30 : vector<32x1xf32>
    %32 = vector.broadcast %27 : vector<32x1xf32> to vector<32x256xf32>
    %33 = arith.subf %8, %32 : vector<32x256xf32>
    %34 = math.exp %33 : vector<32x256xf32>
    %cst_19 = arith.constant dense<0.000000e+00> : vector<32xf32>
    %35 = vector.multi_reduction <add>, %34, %cst_19 [1] : vector<32x256xf32> to vector<32xf32>
    %36 = vector.shape_cast %35 : vector<32xf32> to vector<32x1xf32>
    %37 = arith.addf %31, %36 : vector<32x1xf32>
    %c0_20 = arith.constant 0 : index
    %c0_21 = arith.constant 0 : index
    %38 = vector.load %arg8[%c0_20, %c0_21] : memref<32x1xf32, #tpu.memory_space<vmem>>, vector<32x1xf32>
    tpu.vector_store %arg8[%c0_20, %c0_21], %37 {strides = array<i32>} : memref<32x1xf32, #tpu.memory_space<vmem>>, vector<32x1xf32>,
    %c0_22 = arith.constant 0 : index
    %c0_23 = arith.constant 0 : index
    %39 = vector.load %arg7[%c0_22, %c0_23] : memref<32x1xf32, #tpu.memory_space<vmem>>, vector<32x1xf32>
    tpu.vector_store %arg7[%c0_22, %c0_23], %27 {strides = array<i32>} : memref<32x1xf32, #tpu.memory_space<vmem>>, vector<32x1xf32>,
    %c0_i32_24 = arith.constant 0 : i32
    %40 = arith.cmpi eq, %arg1, %c0_i32_24 : i32
    %41 = arith.extui %40 : i1 to i32
    %c0_i32_25 = arith.constant 0 : i32
    %42 = arith.cmpi ne, %41, %c0_i32_25 : i32
    scf.if %42 {
      %c0_26 = arith.constant 0 : index
      %c0_27 = arith.constant 0 : index
      %43 = vector.load %arg7[%c0_26, %c0_27] : memref<32x1xf32, #tpu.memory_space<vmem>>, vector<32x1xf32>
      %c0_28 = arith.constant 0 : index
      %c0_29 = arith.constant 0 : index
      %44 = vector.load %arg8[%c0_28, %c0_29] : memref<32x1xf32, #tpu.memory_space<vmem>>, vector<32x1xf32>
      %45 = math.log %44 : vector<32x1xf32>
      %46 = arith.addf %43, %45 : vector<32x1xf32>
      %c0_30 = arith.constant 0 : index
      %c0_31 = arith.constant 0 : index
      %47 = vector.load %arg9[%c0_30, %c0_31] : memref<32x1xf32, #tpu.memory_space<vmem>>, vector<32x1xf32>
      %48 = arith.subf %46, %47 : vector<32x1xf32>
      %c0_32 = arith.constant 0 : index
      %c0_33 = arith.constant 0 : index
      %49 = vector.load %arg6[%c0_32, %c0_33] : memref<32x1xf32, #tpu.memory_space<vmem>>, vector<32x1xf32>
      tpu.vector_store %arg6[%c0_32, %c0_33], %48 {strides = array<i32>} : memref<32x1xf32, #tpu.memory_space<vmem>>, vector<32x1xf32>,
    } else {
    }
    return
  }
  func.func @transform_0(%arg0: i32, %arg1: i32) -> (i32, i32) {
    %c0_i32 = arith.constant 0 : i32
    %c0_i32_0 = arith.constant 0 : i32
    return %arg0, %c0_i32 : i32, i32
  }
  func.func @transform_1(%arg0: i32, %arg1: i32) -> (i32, i32) {
    %c0_i32 = arith.constant 0 : i32
    %c0_i32_0 = arith.constant 0 : i32
    return %arg1, %c0_i32 : i32, i32
  }
  func.func @transform_2(%arg0: i32, %arg1: i32) -> (i32, i32) {
    %c0_i32 = arith.constant 0 : i32
    %c0_i32_0 = arith.constant 0 : i32
    return %arg0, %c0_i32 : i32, i32
  }
  func.func @transform_3(%arg0: i32, %arg1: i32) -> (i32, i32) {
    %c0_i32 = arith.constant 0 : i32
    %c0_i32_0 = arith.constant 0 : i32
    return %c0_i32, %arg1 : i32, i32
  }
  func.func @transform_4(%arg0: i32, %arg1: i32) -> (i32, i32) {
    %c0_i32 = arith.constant 0 : i32
    %c0_i32_0 = arith.constant 0 : i32
    return %arg0, %c0_i32 : i32, i32
  }
}

</mosaic_0001>

<bundles_post_ra>
// kernel: plain_header_loss.1
= control target key start
LH: loop header
LB: loop body
LE: loop exit
PB: predicated region body
PF: predicated region fallthrough
CT: control target
= control target key end

     0   :  { %9 = vsyncpa [#allocation6], 0  ;;  %s531_s15 = smov [#allocation5]   ;;  %s730_s0 = inlined_call_operand.vmem [shape: f32[32,128], index: 0, kind: input, shape index: {}]   ;;  %s731_s1 = inlined_call_operand.hbm [shape: f32[256,128], index: 1, kind: input, shape index: {}]   ;;  %s732_s2 = inlined_call_operand.vmem [shape: s32[32,1], index: 2, kind: input, shape index: {}]   ;;  %s733_s3 = inlined_call_operand.vmem [shape: f32[1,256], index: 3, kind: input, shape index: {}]   ;;  %s734_s4 = inlined_call_operand.vmem [shape: f32[32,1], index: 4, kind: output, shape index: {}]  }
   0x1   :  { %s17_s16 = sshll.u32 %s531_s15, 4  ;;  %s18_s16 = int_to_ptr.vmem [resolvable:$true] %s17_s16 }
   0x2   :  { %s517_s17 = scalar_lea.vmem %s18_s16, 4096  ;;  %p522_p1 = scmp.lt.s32.totalorder %s18_s16, %s18_s16 }
   0x3   :  { %p518_p0 = scmp.ne.s32.totalorder %s18_s16, %s517_s17  ;;  %p523_p2 = scmp.lt.s32.totalorder %s517_s17, %s517_s17 }
   0x5   :  { %p524_p3 = por %p523_p2, %p522_p1 }
   0x7   :  { %p525_p4 = pnand %p524_p3, %p518_p0 }
   0x9   :  { %528 = shalt.err (!%p525_p4)
}
   0xa   :  { %s532_s18 = smov 128   ;;  %s533_s19 = smov 8  }
   0xb   :  { %23 = dma.hbm_to_vmem [thread:$0]  %s731_s1, 4096, %s18_s16, [#allocation6], %s532_s18, %s532_s18, %s533_s19  }
   0xc   :  { %529 = dma.done.wait [#allocation6], 4096  }
   0xd   :  { %530 = vsyncadd [#allocation6], 4294963200  ;;  %v83_v0 = vld [vmem:[#allocation5 + $0xf8] sm:$0xff]  ;;  %v82_v2 = vld [vmem:[#allocation5 + $0xf0] sm:$0xff]  ;;  %vm35_vm0 = vcmask 7168   ;;  %v534_v36 = vmov -inf   ;;  %v86_v37 = vlaneseq }
   0xe   :  { %v67_v1 = vld [vmem:[#allocation5 + $0x78] sm:$0xff]  ;;  %397 = vmatprep.subr.mxu0 %v83_v0  ;;  %437 = vmatprep.subr.mxu1 %v83_v0  ;;  %v66_v3 = vld [vmem:[#allocation5 + $0x70] sm:$0xff]  ;;  %v81_v4 = vld [vmem:[#allocation5 + $0xe8] sm:$0xff]  ;;  %38 = vst.msk [vmem:[#allocation2 + $0x10] sm:$0xff] %vm35_vm0, %v534_v36  ;;  %v535_v0 = vmov 0  }
   0xf   :  { %398 = vmatpush3.xpose.msra.mxu0 %v67_v1  ;;  %453 = vmatpush3.xpose.msra.mxu1 %v67_v1  ;;  %v65_v5 = vld [vmem:[#allocation5 + $0x68] sm:$0xff]  ;;  %v80_v6 = vld [vmem:[#allocation5 + $0xe0] sm:$0xff]  ;;  %v573_v9 = vld [vmem:[%s730_s0 + $0x10] sm:$0xff]  ;;  %36 = vst.msk [vmem:[#allocation2] sm:$0xff] %vm35_vm0, %v534_v36  ;;  %v87_v38 = vshrl.u32 %v86_v37, 7  ;;  %v536_v1 = vmov 0.0  }
  0x10   :  { %399 = vmatprep.subr.mxu0 %v82_v2  ;;  %438 = vmatprep.subr.mxu1 %v82_v2  ;;  %v568_v7 = vld [vmem:[%s730_s0] sm:$0xff]  ;;  %v79_v10 = vld [vmem:[#allocation5 + $0xd8] sm:$0xff]  ;;  %v78_v12 = vld [vmem:[#allocation5 + $0xd0] sm:$0xff]  ;;  %37 = vst.msk [vmem:[#allocation2 + $0x8] sm:$0xff] %vm35_vm0, %v534_v36 }
  0x11   :  { %v64_v8 = vld [vmem:[#allocation5 + $0x60] sm:$0xff]  ;;  %429 = vmatprep.mubr.f32.mxu0 %v568_v7  ;;  %433 = vmatprep.mubr.f32.mxu1 %v573_v9  ;;  %v63_v11 = vld [vmem:[#allocation5 + $0x58] sm:$0xff]  ;;  %v62_v13 = vld [vmem:[#allocation5 + $0x50] sm:$0xff]  ;;  %39 = vst.msk [vmem:[#allocation2 + $0x18] sm:$0xff] %vm35_vm0, %v534_v36  ;;  %v88_v39 = vsub.s32 0, %v87_v38  ;;  %v92_v40 = vsub.s32 1, %v87_v38 }
  0x12   :  { %v77_v14 = vld [vmem:[#allocation5 + $0xc8] sm:$0xff]  ;;  %v76_v16 = vld [vmem:[#allocation5 + $0xc0] sm:$0xff]  ;;  %v75_v18 = vld [vmem:[#allocation5 + $0xb8] sm:$0xff]  ;;  %476 = vset.pattern.permute.xlu1 %v535_v0  ;;  %475 = vset.pattern.permute.xlu0 %v535_v0  ;;  %40 = vst.msk [vmem:[#allocation3] sm:$0xff] %vm35_vm0, %v536_v1 }
  0x13   :  { %400 = vmatpush3.xpose.msra.mxu0 %v66_v3  ;;  %454 = vmatpush3.xpose.msra.mxu1 %v66_v3  ;;  %v61_v15 = vld [vmem:[#allocation5 + $0x48] sm:$0xff]  ;;  %v60_v17 = vld [vmem:[#allocation5 + $0x40] sm:$0xff]  ;;  %v59_v19 = vld [vmem:[#allocation5 + $0x38] sm:$0xff]  ;;  %41 = vst.msk [vmem:[#allocation3 + $0x8] sm:$0xff] %vm35_vm0, %v536_v1 }
  0x14   :  { %401 = vmatprep.subr.mxu0 %v81_v4  ;;  %439 = vmatprep.subr.mxu1 %v81_v4  ;;  %v74_v20 = vld [vmem:[#allocation5 + $0xb0] sm:$0xff]  ;;  %v73_v22 = vld [vmem:[#allocation5 + $0xa8] sm:$0xff]  ;;  %v72_v24 = vld [vmem:[#allocation5 + $0xa0] sm:$0xff]  ;;  %42 = vst.msk [vmem:[#allocation3 + $0x10] sm:$0xff] %vm35_vm0, %v536_v1 }
  0x15   :  { %v58_v21 = vld [vmem:[#allocation5 + $0x30] sm:$0xff]  ;;  %v57_v23 = vld [vmem:[#allocation5 + $0x28] sm:$0xff]  ;;  %v56_v25 = vld [vmem:[#allocation5 + $0x20] sm:$0xff]  ;;  %43 = vst.msk [vmem:[#allocation3 + $0x18] sm:$0xff] %vm35_vm0, %v536_v1 }
  0x16   :  { %v71_v26 = vld [vmem:[#allocation5 + $0x98] sm:$0xff]  ;;  %v70_v28 = vld [vmem:[#allocation5 + $0x90] sm:$0xff]  ;;  %v69_v30 = vld [vmem:[#allocation5 + $0x88] sm:$0xff]  ;;  %44 = vst.msk [vmem:[#allocation4] sm:$0xff] %vm35_vm0, %v536_v1 }
  0x17   :  { %402 = vmatpush3.xpose.msra.mxu0 %v65_v5  ;;  %455 = vmatpush3.xpose.msra.mxu1 %v65_v5  ;;  %v55_v27 = vld [vmem:[#allocation5 + $0x18] sm:$0xff]  ;;  %v54_v29 = vld [vmem:[#allocation5 + $0x10] sm:$0xff]  ;;  %v53_v31 = vld [vmem:[#allocation5 + $0x8] sm:$0xff]  ;;  %45 = vst.msk [vmem:[#allocation4 + $0x8] sm:$0xff] %vm35_vm0, %v536_v1 }
  0x18   :  { %403 = vmatprep.subr.mxu0 %v80_v6  ;;  %440 = vmatprep.subr.mxu1 %v80_v6  ;;  %v68_v32 = vld [vmem:[#allocation5 + $0x80] sm:$0xff]  ;;  %v49_v34 = vld [vmem:[%s730_s0 + $0x8] sm:$0xff]  ;;  %v51_v35 = vld [vmem:[%s730_s0 + $0x18] sm:$0xff]  ;;  %46 = vst.msk [vmem:[#allocation4 + $0x10] sm:$0xff] %vm35_vm0, %v536_v1 }
  0x19   :  { %v52_v33 = vld [vmem:[#allocation5] sm:$0xff]  ;;  %47 = vst.msk [vmem:[#allocation4 + $0x18] sm:$0xff] %vm35_vm0, %v536_v1  ;;  %v625_v2 = vld [vmem:[#allocation2 + $0x10] sm:$0xff] }
  0x1a   :  { %v84_v41 = vld [vmem:[%s733_s3] sm:$0x3] }
  0x1b   :  { %404 = vmatpush3.xpose.msra.mxu0 %v64_v8  ;;  %456 = vmatpush3.xpose.msra.mxu1 %v64_v8  ;;  %v89_v42 = vrot.slane %v84_v41, %v88_v39  ;;  %v93_v43 = vrot.slane %v84_v41, %v92_v40  ;;  %v627_v3 = vld [vmem:[#allocation2] sm:$0xff]  ;;  %v635_v8 = vld [vmem:[#allocation2 + $0x8] sm:$0xff] }
  0x1c   :  { %405 = vmatprep.subr.mxu0 %v79_v10  ;;  %441 = vmatprep.subr.mxu1 %v79_v10 }
  0x1f   :  { %406 = vmatpush3.xpose.msra.mxu0 %v63_v11  ;;  %457 = vmatpush3.xpose.msra.mxu1 %v63_v11 }
  0x20   :  { %407 = vmatprep.subr.mxu0 %v78_v12  ;;  %442 = vmatprep.subr.mxu1 %v78_v12 }
  0x23   :  { %408 = vmatpush3.xpose.msra.mxu0 %v62_v13  ;;  %458 = vmatpush3.xpose.msra.mxu1 %v62_v13 }
  0x24   :  { %409 = vmatprep.subr.mxu0 %v77_v14  ;;  %443 = vmatprep.subr.mxu1 %v77_v14 }
  0x27   :  { %410 = vmatpush3.xpose.msra.mxu0 %v61_v15  ;;  %459 = vmatpush3.xpose.msra.mxu1 %v61_v15 }
  0x28   :  { %411 = vmatprep.subr.mxu0 %v76_v16  ;;  %444 = vmatprep.subr.mxu1 %v76_v16 }
  0x2b   :  { %412 = vmatpush3.xpose.msra.mxu0 %v60_v17  ;;  %460 = vmatpush3.xpose.msra.mxu1 %v60_v17 }
  0x2c   :  { %413 = vmatprep.subr.mxu0 %v75_v18  ;;  %445 = vmatprep.subr.mxu1 %v75_v18  ;;  %v192_v18 = vld [vmem:[%s732_s2] sm:$0xff] }
  0x2f   :  { %414 = vmatpush3.xpose.msra.mxu0 %v59_v19  ;;  %461 = vmatpush3.xpose.msra.mxu1 %v59_v19  ;;  %v193_v19 = vld [vmem:[%s732_s2 + $0x8] sm:$0xff] }
  0x30   :  { %415 = vmatprep.subr.mxu0 %v74_v20  ;;  %446 = vmatprep.subr.mxu1 %v74_v20  ;;  %v194_v20 = vld [vmem:[%s732_s2 + $0x10] sm:$0xff] }
  0x33   :  { %416 = vmatpush3.xpose.msra.mxu0 %v58_v21  ;;  %462 = vmatpush3.xpose.msra.mxu1 %v58_v21  ;;  %v195_v21 = vld [vmem:[%s732_s2 + $0x18] sm:$0xff] }
  0x34   :  { %417 = vmatprep.subr.mxu0 %v73_v22  ;;  %447 = vmatprep.subr.mxu1 %v73_v22 }
  0x37   :  { %418 = vmatpush3.xpose.msra.mxu0 %v57_v23  ;;  %463 = vmatpush3.xpose.msra.mxu1 %v57_v23 }
  0x38   :  { %419 = vmatprep.subr.mxu0 %v72_v24  ;;  %448 = vmatprep.subr.mxu1 %v72_v24 }
  0x3b   :  { %420 = vmatpush3.xpose.msra.mxu0 %v56_v25  ;;  %464 = vmatpush3.xpose.msra.mxu1 %v56_v25 }
  0x3c   :  { %421 = vmatprep.subr.mxu0 %v71_v26  ;;  %449 = vmatprep.subr.mxu1 %v71_v26 }
  0x3f   :  { %422 = vmatpush3.xpose.msra.mxu0 %v55_v27  ;;  %465 = vmatpush3.xpose.msra.mxu1 %v55_v27 }
  0x40   :  { %423 = vmatprep.subr.mxu0 %v70_v28  ;;  %450 = vmatprep.subr.mxu1 %v70_v28 }
  0x43   :  { %424 = vmatpush3.xpose.msra.mxu0 %v54_v29  ;;  %466 = vmatpush3.xpose.msra.mxu1 %v54_v29 }
  0x44   :  { %425 = vmatprep.subr.mxu0 %v69_v30  ;;  %451 = vmatprep.subr.mxu1 %v69_v30 }
  0x47   :  { %426 = vmatpush3.xpose.msra.mxu0 %v53_v31  ;;  %467 = vmatpush3.xpose.msra.mxu1 %v53_v31 }
  0x48   :  { %427 = vmatprep.subr.mxu0 %v68_v32  ;;  %452 = vmatprep.subr.mxu1 %v68_v32 }
  0x4b   :  { %428 = vmatpush3.xpose.msra.mxu0 %v52_v33  ;;  %468 = vmatpush3.xpose.msra.mxu1 %v52_v33 }
  0x4e   :  { %430 = vmatmul.mubr.f32.vlgmr.msra.gmra.mxu0 %v568_v7  ;;  %434 = vmatmul.mubr.f32.vlgmr.msra.gmra.mxu1 %v573_v9  ;;  %v637_v9 = vld [vmem:[#allocation2 + $0x18] sm:$0xff] }
  0x4f   :  { %431 = vmatprep.mubr.f32.mxu0 %v49_v34  ;;  %435 = vmatprep.mubr.f32.mxu1 %v51_v35 }
  0x52   :  { %432 = vmatmul.mubr.f32.gmra.mxu0 %v49_v34  ;;  %436 = vmatmul.mubr.f32.gmra.mxu1 %v51_v35 }
 0x10e   :  { %v162_v44 = vpop.f32.mrf.mxu0  ;;  %v174_v45 = vpop.f32.mrf.mxu1 }
 0x10f   :  { %v593_v48 = vadd.f32 %v162_v44, %v89_v42  ;;  %v595_v49 = vadd.f32 %v174_v45, %v89_v42  ;;  %v186_v45 = vand.u32 127, %v86_v37 }
 0x110   :  { %v164_v46 = vpop.f32.mrf.mxu0  ;;  %v176_v47 = vpop.f32.mrf.mxu1 }
 0x111   :  { %v597_v50 = vadd.f32 %v164_v46, %v93_v43  ;;  %v599_v51 = vadd.f32 %v176_v47, %v93_v43 }
 0x112   :  { %v168_v52 = vpop.f32.mrf.mxu0  ;;  %v180_v53 = vpop.f32.mrf.mxu1 }
 0x113   :  { %v601_v54 = vadd.f32 %v180_v53, %v89_v42  ;;  %v259_v55 = vmax.f32 %v595_v49, %v599_v51  ;;  %v253_v56 = vmax.f32 %v593_v48, %v597_v50  ;;  %v607_v59 = vadd.f32 %v168_v52, %v89_v42 }
 0x114   :  { %v170_v57 = vpop.f32.mrf.mxu0  ;;  %v182_v58 = vpop.f32.mrf.mxu1 }
 0x115   :  { %v609_v60 = vadd.f32 %v170_v57, %v93_v43  ;;  %260 = vmax.xlane.f32.xlu1 %v259_v55  ;;  %254 = vmax.xlane.f32.xlu0 %v253_v56  ;;  %v611_v61 = vadd.f32 %v182_v58, %v93_v43  ;;  %v187_v55 = vadd.s32 128, %v186_v45 }
 0x117   :  { %v256_v62 = vmax.f32 %v607_v59, %v609_v60  ;;  %v262_v63 = vmax.f32 %v601_v54, %v611_v61 }
 0x119   :  { %257 = vmax.xlane.f32.xlu0 %v256_v62  ;;  %263 = vmax.xlane.f32.xlu1 %v262_v63 }
 0x19e   :  { %v261_v4 = vpop.xlane.xlu1 %260  ;;  %v255_v5 = vpop.xlane.xlu0 %254 }
 0x19f   :  { %v630_v6 = vmax.f32 %v625_v2, %v261_v4  ;;  %v633_v7 = vmax.f32 %v627_v3, %v255_v5 }
 0x1a1   :  { %v271_v10 = vsub.f32 %v625_v2, %v630_v6  ;;  %355 = vst.msk [vmem:[#allocation2 + $0x10] sm:$0xff] %vm35_vm0, %v630_v6  ;;  %v269_v11 = vsub.f32 %v627_v3, %v633_v7  ;;  %353 = vst.msk [vmem:[#allocation2] sm:$0xff] %vm35_vm0, %v633_v7  ;;  %301 = vperm.xlu1 %476, %v630_v6   ;;  %291 = vperm.xlu0 %475, %v633_v7   ;;  %v282_v7 = vld [vmem:[#allocation3 + $0x8] sm:$0xff]  ;;  %v284_v2 = vld [vmem:[#allocation3 + $0x18] sm:$0xff] }
 0x1a2   :  { %v258_v12 = vpop.xlane.xlu0 %257  ;;  %v264_v13 = vpop.xlane.xlu1 %263  ;;  %v283_v6 = vld [vmem:[#allocation3 + $0x10] sm:$0xff] }
 0x1a3   :  { %v650_v14 = vmax.f32 %v635_v8, %v258_v12  ;;  %v653_v15 = vmax.f32 %v637_v9, %v264_v13 }
 0x1a5   :  { %v270_v16 = vsub.f32 %v635_v8, %v650_v14  ;;  %354 = vst.msk [vmem:[#allocation2 + $0x8] sm:$0xff] %vm35_vm0, %v650_v14  ;;  %v272_v17 = vsub.f32 %v637_v9, %v653_v15  ;;  %356 = vst.msk [vmem:[#allocation2 + $0x18] sm:$0xff] %vm35_vm0, %v653_v15  ;;  %296 = vperm.xlu1 %476, %v650_v14  }
 0x1a9   :  { %306 = vperm.xlu1 %476, %v653_v15  }
 0x1ad   :  { %201 = vperm.xlu1 %476, %v192_v18  }
 0x1b1   :  { %204 = vperm.xlu1 %476, %v193_v19  }
 0x1b5   :  { %207 = vperm.xlu1 %476, %v194_v20  }
 0x1b9   :  { %210 = vperm.xlu1 %476, %v195_v21  }
 0x21c   :  { %v302_v22 = vpop.permute.xlu1 %301  ;;  %v292_v23 = vpop.permute.xlu0 %291 }
 0x21d   :  { %v309_v24 = vsub.f32 %v593_v48, %v292_v23  ;;  %v310_v25 = vsub.f32 %v597_v50, %v292_v23  ;;  %v313_v26 = vsub.f32 %v595_v49, %v302_v22  ;;  %v314_v28 = vsub.f32 %v599_v51, %v302_v22 }
 0x21f   :  { %v317_v27 = vmul.f32 1.442695, %v309_v24  ;;  %v319_v29 = vmul.f32 1.442695, %v310_v25  ;;  %v325_v33 = vmul.f32 1.442695, %v313_v26 }
 0x220   :  { %v297_v30 = vpop.permute.xlu1 %296  ;;  %v327_v36 = vmul.f32 1.442695, %v314_v28  ;;  %v281_v25 = vld [vmem:[#allocation3] sm:$0xff] }
 0x221   :  { %v311_v31 = vsub.f32 %v607_v59, %v297_v30  ;;  %v312_v32 = vsub.f32 %v609_v60, %v297_v30  ;;  %477 = vpow2.f32 %v317_v27 }
 0x222   :  { %479 = vpow2.f32 %v319_v29 }
 0x223   :  { %v321_v34 = vmul.f32 1.442695, %v311_v31  ;;  %v323_v35 = vmul.f32 1.442695, %v312_v32  ;;  %v197_v32 = vld [vmem:[#allocation4 + $0x8] sm:$0xff] }
 0x224   :  { %v307_v38 = vpop.permute.xlu1 %306 }
 0x225   :  { %481 = vpow2.f32 %v321_v34  ;;  %v315_v39 = vsub.f32 %v601_v54, %v307_v38  ;;  %v316_v40 = vsub.f32 %v611_v61, %v307_v38 }
 0x226   :  { %483 = vpow2.f32 %v323_v35 }
 0x227   :  { %485 = vpow2.f32 %v325_v33  ;;  %v329_v41 = vmul.f32 1.442695, %v315_v39  ;;  %v331_v42 = vmul.f32 1.442695, %v316_v40  ;;  %v196_v33 = vld [vmem:[#allocation4] sm:$0xff] }
 0x228   :  { %487 = vpow2.f32 %v327_v36  ;;  %v202_v43 = vpop.permute.xlu1 %201 }
 0x229   :  { %489 = vpow2.f32 %v329_v41  ;;  %vm212_vm1 = vcmp.eq.s32.totalorder %v186_v45, %v202_v43  ;;  %vm213_vm2 = vcmp.eq.s32.totalorder %v187_v55, %v202_v43  ;;  %v199_v41 = vld [vmem:[#allocation4 + $0x18] sm:$0xff] }
 0x22a   :  { %491 = vpow2.f32 %v331_v42  ;;  %v220_v12 = vsel %vm212_vm1, %v593_v48, 0.0  ;;  %v221_v13 = vsel %vm213_vm2, %v597_v50, 0.0  ;;  %v198_v42 = vld [vmem:[#allocation4 + $0x10] sm:$0xff] }
 0x22b   :  { %v228_v20 = vadd.f32 %v221_v13, %v220_v12 }
 0x22c   :  { %v205_v44 = vpop.permute.xlu1 %204 }
 0x22d   :  { %vm214_vm3 = vcmp.eq.s32.totalorder %v186_v45, %v205_v44  ;;  %vm215_vm4 = vcmp.eq.s32.totalorder %v187_v55, %v205_v44 }
 0x22e   :  { %v478_v46 = vpop.eup %477  ;;  %v222_v18 = vsel %vm214_vm3, %v607_v59, 0.0  ;;  %v223_v19 = vsel %vm215_vm4, %v609_v60, 0.0  ;;  %v273_v60 = vmul.f32 1.442695, %v269_v11 }
 0x22f   :  { %v480_v47 = vpop.eup %479  ;;  %v231_v21 = vadd.f32 %v223_v19, %v222_v18  ;;  %v363_v19 = vld [vmem:[#allocation2 + $0x18] sm:$0xff] }
 0x230   :  { %v208_v52 = vpop.permute.xlu1 %207  ;;  %v333_v56 = vadd.f32 %v480_v47, %v478_v46  ;;  %493 = vpow2.f32 %v273_v60 }
 0x231   :  { %vm216_vm5 = vcmp.eq.s32.totalorder %v186_v45, %v208_v52  ;;  %vm217_vm6 = vcmp.eq.s32.totalorder %v187_v55, %v208_v52 }
 0x232   :  { %v482_v53 = vpop.eup %481  ;;  %334 = vadd.xlane.f32.xlu1 %v333_v56  ;;  %v224_v22 = vsel %vm216_vm5, %v595_v49, 0.0  ;;  %v225_v23 = vsel %vm217_vm6, %v599_v51, 0.0  ;;  %v275_v49 = vmul.f32 1.442695, %v270_v16  ;;  %v277_v51 = vmul.f32 1.442695, %v271_v10 }
 0x233   :  { %v484_v57 = vpop.eup %483  ;;  %v234_v50 = vadd.f32 %v225_v23, %v224_v22 }
 0x234   :  { %v486_v58 = vpop.eup %485  ;;  %v336_v62 = vadd.f32 %v484_v57, %v482_v53  ;;  %v211_v4 = vpop.permute.xlu1 %210  ;;  %495 = vpow2.f32 %v275_v49  ;;  %v360_v57 = vld [vmem:[#allocation2] sm:$0xff] }
 0x235   :  { %v488_v63 = vpop.eup %487  ;;  %vm218_vm7 = vcmp.eq.s32.totalorder %v186_v45, %v211_v4  ;;  %vm219_vm8 = vcmp.eq.s32.totalorder %v187_v55, %v211_v4  ;;  %497 = vpow2.f32 %v277_v51 }
 0x236   :  { %v490_v0 = vpop.eup %489  ;;  %337 = vadd.xlane.f32.xlu0 %v336_v62  ;;  %v339_v37 = vadd.f32 %v488_v63, %v486_v58  ;;  %v226_v48 = vsel %vm218_vm7, %v601_v54, 0.0  ;;  %v227_v24 = vsel %vm219_vm8, %v611_v61, 0.0  ;;  %v279_v54 = vmul.f32 1.442695, %v272_v17  ;;  %v361_v63 = vld [vmem:[#allocation2 + $0x8] sm:$0xff] }
 0x237   :  { %v492_v1 = vpop.eup %491  ;;  %v237_v59 = vadd.f32 %v227_v24, %v226_v48 }
 0x238   :  { %v342_v5 = vadd.f32 %v492_v1, %v490_v0  ;;  %499 = vpow2.f32 %v279_v54 }
 0x23a   :  { %340 = vadd.xlane.f32.xlu0 %v339_v37  ;;  %343 = vadd.xlane.f32.xlu1 %v342_v5 }
 0x23d   :  { %v494_v61 = vpop.eup %493 }
 0x23e   :  { %229 = vadd.xlane.f32.xlu0 %v228_v20  ;;  %232 = vadd.xlane.f32.xlu1 %v231_v21  ;;  %v285_v11 = vmul.f32 %v494_v61, %v281_v25  ;;  %v362_v21 = vld [vmem:[#allocation2 + $0x10] sm:$0xff] }
 0x241   :  { %v496_v3 = vpop.eup %495 }
 0x242   :  { %235 = vadd.xlane.f32.xlu0 %v234_v50  ;;  %238 = vadd.xlane.f32.xlu1 %v237_v59  ;;  %v498_v8 = vpop.eup %497  ;;  %v286_v16 = vmul.f32 %v496_v3, %v282_v7 }
 0x243   :  { %v287_v15 = vmul.f32 %v498_v8, %v283_v6 }
 0x245   :  { %v500_v27 = vpop.eup %499 }
 0x246   :  { %v288_v9 = vmul.f32 %v500_v27, %v284_v2 }
 0x2bb   :  { %v335_v26 = vpop.xlane.xlu1 %334 }
 0x2bc   :  { %v345_v14 = vadd.f32 %v335_v26, %v285_v11 }
 0x2be   :  { %349 = vst.msk [vmem:[#allocation3] sm:$0xff] %vm35_vm0, %v345_v14 }
 0x2bf   :  { %v338_v28 = vpop.xlane.xlu0 %337 }
 0x2c0   :  { %v346_v10 = vadd.f32 %v338_v28, %v286_v16 }
 0x2c2   :  { %350 = vst.msk [vmem:[#allocation3 + $0x8] sm:$0xff] %vm35_vm0, %v346_v10 }
 0x2c3   :  { %v344_v17 = vpop.xlane.xlu1 %343  ;;  %v341_v29 = vpop.xlane.xlu0 %340 }
 0x2c4   :  { %v348_v30 = vadd.f32 %v344_v17, %v288_v9  ;;  %v347_v31 = vadd.f32 %v341_v29, %v287_v15 }
 0x2c5   :  { %v364_v34 = vld [vmem:[#allocation3] sm:$0xff] }
 0x2c6   :  { %352 = vst.msk [vmem:[#allocation3 + $0x18] sm:$0xff] %vm35_vm0, %v348_v30  ;;  %351 = vst.msk [vmem:[#allocation3 + $0x10] sm:$0xff] %vm35_vm0, %v347_v31  ;;  %501 = vlog2.f32 %v364_v34 }
 0x2c7   :  { %v233_v35 = vpop.xlane.xlu1 %232  ;;  %v230_v36 = vpop.xlane.xlu0 %229 }
 0x2c8   :  { %v241_v38 = vadd.f32 %v233_v35, %v197_v32  ;;  %v240_v39 = vadd.f32 %v230_v36, %v196_v33 }
 0x2c9   :  { %v365_v40 = vld [vmem:[#allocation3 + $0x8] sm:$0xff] }
 0x2ca   :  { %503 = vlog2.f32 %v365_v40  ;;  %246 = vst.msk [vmem:[#allocation4 + $0x8] sm:$0xff] %vm35_vm0, %v241_v38  ;;  %245 = vst.msk [vmem:[#allocation4] sm:$0xff] %vm35_vm0, %v240_v39 }
 0x2cb   :  { %v239_v43 = vpop.xlane.xlu1 %238  ;;  %v236_v44 = vpop.xlane.xlu0 %235 }
 0x2cc   :  { %v243_v45 = vadd.f32 %v239_v43, %v199_v41  ;;  %v242_v46 = vadd.f32 %v236_v44, %v198_v42 }
 0x2cd   :  { %v367_v47 = vld [vmem:[#allocation3 + $0x18] sm:$0xff]  ;;  %v366_v52 = vld [vmem:[#allocation3 + $0x10] sm:$0xff] }
 0x2ce   :  { %505 = vlog2.f32 %v367_v47  ;;  %248 = vst.msk [vmem:[#allocation4 + $0x18] sm:$0xff] %vm35_vm0, %v243_v45  ;;  %247 = vst.msk [vmem:[#allocation4 + $0x10] sm:$0xff] %vm35_vm0, %v242_v46 }
 0x2cf   :  { %507 = vlog2.f32 %v366_v52 }
 0x2d1   :  { %v380_v0 = vld [vmem:[#allocation4] sm:$0xff]  ;;  %v381_v5 = vld [vmem:[#allocation4 + $0x8] sm:$0xff] }
 0x2d3   :  { %v502_v53 = vpop.eup %501 }
 0x2d4   :  { %v369_v55 = vmul.f32 0.6931472, %v502_v53 }
 0x2d5   :  { %v383_v23 = vld [vmem:[#allocation4 + $0x18] sm:$0xff]  ;;  %v382_v50 = vld [vmem:[#allocation4 + $0x10] sm:$0xff] }
 0x2d6   :  { %v376_v62 = vadd.f32 %v369_v55, %v360_v57 }
 0x2d7   :  { %v504_v56 = vpop.eup %503 }
 0x2d8   :  { %v371_v58 = vmul.f32 0.6931472, %v504_v56  ;;  %v384_v4 = vsub.f32 %v376_v62, %v380_v0 }
 0x2da   :  { %v377_v1 = vadd.f32 %v371_v58, %v361_v63  ;;  %388 = vst.msk [vmem:[%s734_s4] sm:$0xff] %vm35_vm0, %v384_v4 }
 0x2db   :  { %v506_v37 = vpop.eup %505 }
 0x2dc   :  { %v508_v12 = vpop.eup %507  ;;  %v385_v13 = vsub.f32 %v377_v1, %v381_v5  ;;  %v375_v18 = vmul.f32 0.6931472, %v506_v37 }
 0x2dd   :  { %v373_v20 = vmul.f32 0.6931472, %v508_v12 }
 0x2de   :  { %389 = vst.msk [vmem:[%s734_s4 + $0x8] sm:$0xff] %vm35_vm0, %v385_v13  ;;  %v379_v22 = vadd.f32 %v375_v18, %v363_v19 }
 0x2df   :  { %v378_v48 = vadd.f32 %v373_v20, %v362_v21 }
 0x2e0   :  { %v387_v24 = vsub.f32 %v379_v22, %v383_v23 }
 0x2e1   :  { %v386_v59 = vsub.f32 %v378_v48, %v382_v50 }
 0x2e2   :  { %391 = vst.msk [vmem:[%s734_s4 + $0x18] sm:$0xff] %vm35_vm0, %v387_v24 }
 0x2e3   :  { %390 = vst.msk [vmem:[%s734_s4 + $0x10] sm:$0xff] %vm35_vm0, %v386_v59 }
 0x2e4   :  { %396 = vsyncpa [#allocation6], 1 }

</bundles_post_ra>
